<compile_context>
chip_gen: v7x
topology: tpu7x:2x2x1
jax: 0.10.0
libtpu: 0.0.40
codegen_flags: <defaults>
</compile_context>

<pallas_src>
import functools

import jax
import jax.numpy as jnp
from jax.experimental import pallas as pl
from jax.experimental.pallas import tpu as pltpu

_VMEM_LIMIT = 48 * 1024 * 1024  # conservative across v5e/v6e/v7x (v7x has 64 MiB physical)


def _choose_rows(rows, cols, itemsize, target_bytes=4 * 1024 * 1024, cap=1024):
    """Rows per tile: big enough to approach HBM roofline, small enough for VMEM."""
    tm = max(1, target_bytes // max(1, cols * itemsize))
    tm = min(tm, cap, rows)
    if tm >= rows:
        return rows                       # full extent -> always a legal block dim
    tm = max(8, (tm // 8) * 8)            # sublane-aligned when not full extent
    return min(tm, rows)


# ----------------------------- LayerNorm kernel ------------------------------
def _layernorm_kernel(x_ref, a_ref, b_ref, o_ref, *, eps):
    x = x_ref[...].astype(jnp.float32)                     # (TM, F)
    n = x.shape[-1]
    mean = jnp.mean(x, axis=-1, keepdims=True)
    diff = x - mean
    # torch.std: unbiased (divide by N-1), eps added to std (not var). NOTE: F must be > 1.
    var = jnp.sum(diff * diff, axis=-1, keepdims=True) * (1.0 / (n - 1))
    inv = 1.0 / (jnp.sqrt(var) + eps)                      # one divide per row
    y = a_ref[...].astype(jnp.float32) * (diff * inv) + b_ref[...].astype(jnp.float32)
    o_ref[...] = y.astype(o_ref.dtype)


def layernorm_pallas(x, a2, b2, eps=1e-6):
    orig_shape = x.shape
    F = orig_shape[-1]
    R = x.size // F
    x2 = x.reshape(R, F)
    tm = _choose_rows(R, F, x.dtype.itemsize)
    grid = (pl.cdiv(R, tm),)
    out = pl.pallas_call(
        functools.partial(_layernorm_kernel, eps=eps),
        out_shape=jax.ShapeDtypeStruct((R, F), x.dtype),
        grid_spec=pltpu.PrefetchScalarGridSpec(
            num_scalar_prefetch=0,
            grid=grid,
            in_specs=[
                pl.BlockSpec((tm, F), lambda i: (i, 0)),
                pl.BlockSpec((1, F), lambda i: (0, 0)),
                pl.BlockSpec((1, F), lambda i: (0, 0)),
            ],
            out_specs=pl.BlockSpec((tm, F), lambda i: (i, 0)),
        ),
        compiler_params=pltpu.CompilerParams(
            dimension_semantics=("parallel",),
            vmem_limit_bytes=_VMEM_LIMIT,
        ),
    )(x2, a2.reshape(1, F), b2.reshape(1, F))
    return out.reshape(orig_shape)


# ---------------------- residual + (inverted) dropout kernel -----------------
def _hash_u32(x):
    # Small integer-hash finalizer (xorshift-multiply). Pure VPU int ops:
    # works on TPU hardware AND in interpret mode (no pltpu.prng_* needed).
    x = x ^ (x >> 16)
    x = x * jnp.uint32(0x7FEB352D)
    x = x ^ (x >> 15)
    x = x * jnp.uint32(0x846CA68B)
    x = x ^ (x >> 16)
    return x


def _residual_dropout_kernel(seed_ref, x_ref, y_ref, o_ref, *, p):
    x = x_ref[...]                                          # (TM, L), native dtype
    y = y_ref[...]
    if p > 0.0:
        rows, cols = y.shape
        # Globally unique per-element counter (block offset + in-block index).
        base = pl.program_id(0).astype(jnp.uint32) * jnp.uint32(rows * cols)
        ridx = jax.lax.broadcasted_iota(jnp.uint32, y.shape, 0)
        cidx = jax.lax.broadcasted_iota(jnp.uint32, y.shape, 1)
        ctr = base + ridx * jnp.uint32(cols) + cidx
        seed = seed_ref[0].astype(jnp.uint32) * jnp.uint32(0x9E3779B9)
        bits = _hash_u32(ctr ^ seed)
        # keep prob ~ 1-p (quantized to 1/2^32); inverted-dropout scaling folded in.
        threshold = jnp.uint32(min(int(round(p * 4294967296.0)), 4294967295))
        inv_keep = jnp.asarray(1.0 / (1.0 - p), dtype=y.dtype)
        y = jnp.where(bits >= threshold, y * inv_keep, jnp.asarray(0.0, y.dtype))
    o_ref[...] = (x + y).astype(o_ref.dtype)


def residual_dropout_pallas(x, y, seed, dropout_p):
    assert x.shape == y.shape and x.dtype == y.dtype
    total = x.size
    # Lane-dense flatten: the pass is purely elementwise, so pick a wide last dim
    # (multiple of 128) to avoid masked partial stores.
    lane = x.shape[-1]
    for cand in (4096, 2048, 1024, 512, 256, 128):
        if total % cand == 0:
            lane = cand
            break
    rows = total // lane
    x2 = x.reshape(rows, lane)
    y2 = y.reshape(rows, lane)
    tm = _choose_rows(rows, lane, x.dtype.itemsize)
    grid = (pl.cdiv(rows, tm),)
    if isinstance(seed, jax.Array):
        seed_arr = seed.reshape(-1)[:1].astype(jnp.int32)
    else:
        seed_arr = jnp.asarray([seed], jnp.int32)
    out = pl.pallas_call(
        functools.partial(_residual_dropout_kernel, p=float(dropout_p)),
        out_shape=jax.ShapeDtypeStruct((rows, lane), x.dtype),
        grid_spec=pltpu.PrefetchScalarGridSpec(
            num_scalar_prefetch=1,
            grid=grid,
            in_specs=[
                pl.BlockSpec((tm, lane), lambda i, seed_ref: (i, 0)),
                pl.BlockSpec((tm, lane), lambda i, seed_ref: (i, 0)),
            ],
            out_specs=pl.BlockSpec((tm, lane), lambda i, seed_ref: (i, 0)),
        ),
        compiler_params=pltpu.CompilerParams(
            dimension_semantics=("parallel",),
            vmem_limit_bytes=_VMEM_LIMIT,
        ),
    )(seed_arr, x2, y2)
    return out.reshape(x.shape)


# ------------------------------ module wrapper --------------------------------
def sublayer_connection(x, sublayer, a2, b2, dropout_p, seed, eps=1e-6):
    """JAX/Pallas equivalent of SublayerConnection.forward(x, sublayer)."""
    normed = layernorm_pallas(x, a2, b2, eps)               # Pallas: layernorm
    y = sublayer(normed)                                    # arbitrary user sublayer (plain JAX)
    # TODO(synk): when the sublayer is a known matmul, fuse LN -> MXU matmul ->
    # dropout+residual into one Pallas kernel to cut ~3 full HBM passes.
    return residual_dropout_pallas(x, y, seed, dropout_p)   # Pallas: dropout + residual


if __name__ == "__main__":
    B, S, F = 2, 8, 32
    dropout_p = 0.1
    eps = 1e-6

    key = jax.random.PRNGKey(0)
    kx, kw = jax.random.split(key)
    x = jax.random.normal(kx, (B, S, F), dtype=jnp.float32)

    # LayerNorm params (as in __init__: ones / zeros of shape (features,))
    a2 = jnp.ones((F,), dtype=jnp.float32)
    b2 = jnp.zeros((F,), dtype=jnp.float32)

    # A deterministic example "sublayer" (small linear map), passed like the
    # PyTorch forward's `sublayer` callable.
    W = 0.02 * jax.random.normal(kw, (F, F), dtype=jnp.float32)
    sublayer = lambda h: jnp.einsum("bsf,fg->bsg", h, W)

    # Deterministic check (dropout disabled) against a pure-JAX reference.
    out_nodrop = sublayer_connection(x, sublayer, a2, b2, 0.0, seed=0, eps=eps)
    mean = jnp.mean(x, axis=-1, keepdims=True)
    std = jnp.std(x, axis=-1, keepdims=True, ddof=1)
    normed_ref = a2 * (x - mean) / (std + eps) + b2
    ref = x + sublayer(normed_ref)
    assert jnp.allclose(out_nodrop, ref, atol=1e-5, rtol=1e-5)

    # Stochastic path (training-mode dropout).
    out = sublayer_connection(x, sublayer, a2, b2, dropout_p, seed=1234, eps=eps)
    jax.block_until_ready(out)
    assert out.shape == (B, S, F) and out.dtype == jnp.float32
    assert bool(jnp.all(jnp.isfinite(out)))
    print("KERNEL_OK")
</pallas_src>

<mosaic_0001>
module attributes {stable_mosaic.version = 11 : i64} {
  func.func @_layernorm_kernel(%arg0: i32, %arg1: memref<16x32xf32, #tpu.memory_space<vmem>>, %arg2: memref<1x32xf32, #tpu.memory_space<vmem>>, %arg3: memref<1x32xf32, #tpu.memory_space<vmem>>, %arg4: memref<16x32xf32, #tpu.memory_space<vmem>>) attributes {dimension_semantics = [#tpu.dimension_semantics<parallel>], iteration_bounds = array<i64: 1>, scalar_prefetch = 0 : i64, scratch_operands = 0 : i64, tpu.core_type = #tpu.core_type<tc>, window_params = [{transform_indices = @transform_0, window_bounds = array<i64: 16, 32>}, {pipeline_mode = #tpu.pipeline_mode<synchronous>, transform_indices = @transform_1, window_bounds = array<i64: 1, 32>}, {pipeline_mode = #tpu.pipeline_mode<synchronous>, transform_indices = @transform_2, window_bounds = array<i64: 1, 32>}, {transform_indices = @transform_3, window_bounds = array<i64: 16, 32>}]} {
    %c0 = arith.constant 0 : index
    %c0_0 = arith.constant 0 : index
    %0 = vector.load %arg1[%c0, %c0_0] : memref<16x32xf32, #tpu.memory_space<vmem>>, vector<16x32xf32>
    %cst = arith.constant dense<0.000000e+00> : vector<16xf32>
    %1 = vector.multi_reduction <add>, %0, %cst [1] : vector<16x32xf32> to vector<16xf32>
    %2 = vector.shape_cast %1 : vector<16xf32> to vector<16x1xf32>
    %cst_1 = arith.constant 3.200000e+01 : f32
    %3 = vector.broadcast %cst_1 : f32 to vector<16x1xf32>
    %4 = arith.divf %2, %3 : vector<16x1xf32>
    %5 = vector.broadcast %4 : vector<16x1xf32> to vector<16x32xf32>
    %6 = arith.subf %0, %5 : vector<16x32xf32>
    %7 = arith.mulf %6, %6 : vector<16x32xf32>
    %cst_2 = arith.constant dense<0.000000e+00> : vector<16xf32>
    %8 = vector.multi_reduction <add>, %7, %cst_2 [1] : vector<16x32xf32> to vector<16xf32>
    %9 = vector.shape_cast %8 : vector<16xf32> to vector<16x1xf32>
    %cst_3 = arith.constant 0.0322580636 : f32
    %10 = vector.broadcast %cst_3 : f32 to vector<16x1xf32>
    %11 = arith.mulf %9, %10 : vector<16x1xf32>
    %12 = math.sqrt %11 : vector<16x1xf32>
    %cst_4 = arith.constant 9.99999997E-7 : f32
    %13 = vector.broadcast %cst_4 : f32 to vector<16x1xf32>
    %14 = arith.addf %12, %13 : vector<16x1xf32>
    %cst_5 = arith.constant 1.000000e+00 : f32
    %15 = vector.broadcast %cst_5 : f32 to vector<16x1xf32>
    %16 = arith.divf %15, %14 : vector<16x1xf32>
    %c0_6 = arith.constant 0 : index
    %c0_7 = arith.constant 0 : index
    %17 = vector.load %arg2[%c0_6, %c0_7] : memref<1x32xf32, #tpu.memory_space<vmem>>, vector<1x32xf32>
    %18 = vector.broadcast %16 : vector<16x1xf32> to vector<16x32xf32>
    %19 = arith.mulf %6, %18 : vector<16x32xf32>
    %20 = vector.broadcast %17 : vector<1x32xf32> to vector<16x32xf32>
    %21 = arith.mulf %20, %19 : vector<16x32xf32>
    %c0_8 = arith.constant 0 : index
    %c0_9 = arith.constant 0 : index
    %22 = vector.load %arg3[%c0_8, %c0_9] : memref<1x32xf32, #tpu.memory_space<vmem>>, vector<1x32xf32>
    %23 = vector.broadcast %22 : vector<1x32xf32> to vector<16x32xf32>
    %24 = arith.addf %21, %23 : vector<16x32xf32>
    %c0_10 = arith.constant 0 : index
    %c0_11 = arith.constant 0 : index
    %25 = vector.load %arg4[%c0_10, %c0_11] : memref<16x32xf32, #tpu.memory_space<vmem>>, vector<16x32xf32>
    tpu.vector_store %arg4[%c0_10, %c0_11], %24 {strides = array<i32>} : memref<16x32xf32, #tpu.memory_space<vmem>>, vector<16x32xf32>,
    return
  }
  func.func @transform_0(%arg0: i32) -> (i32, i32) {
    %c0_i32 = arith.constant 0 : i32
    %c0_i32_0 = arith.constant 0 : i32
    return %arg0, %c0_i32 : i32, i32
  }
  func.func @transform_1(%arg0: i32) -> (i32, i32) {
    %c0_i32 = arith.constant 0 : i32
    %c0_i32_0 = arith.constant 0 : i32
    %c0_i32_1 = arith.constant 0 : i32
    return %c0_i32, %c0_i32_0 : i32, i32
  }
  func.func @transform_2(%arg0: i32) -> (i32, i32) {
    %c0_i32 = arith.constant 0 : i32
    %c0_i32_0 = arith.constant 0 : i32
    %c0_i32_1 = arith.constant 0 : i32
    return %c0_i32, %c0_i32_0 : i32, i32
  }
  func.func @transform_3(%arg0: i32) -> (i32, i32) {
    %c0_i32 = arith.constant 0 : i32
    %c0_i32_0 = arith.constant 0 : i32
    return %arg0, %c0_i32 : i32, i32
  }
}

</mosaic_0001>

<bundles_post_ra>
// kernel: tpu_custom_call.1
= control target key start
LH: loop header
LB: loop body
LE: loop exit
PB: predicated region body
PF: predicated region fallthrough
CT: control target
= control target key end

     0   :  { %8 = vsyncpa [#allocation3], 0  ;;  %s240_s0 = inlined_call_operand.hbm [shape: f32[16,32], index: 0, kind: input, shape index: {}]   ;;  %s241_s1 = inlined_call_operand.vmem [shape: f32[1,32], index: 1, kind: input, shape index: {}]   ;;  %s242_s2 = inlined_call_operand.vmem [shape: f32[1,32], index: 2, kind: input, shape index: {}]   ;;  %s243_s3 = inlined_call_operand.hbm [shape: f32[16,32], index: 3, kind: output, shape index: {}]  }
   0x1   :  { %9 = vsyncpa [#allocation4], 0  ;;  %s174_s12 = smov [#allocation2]   ;;  %s126_s16 = scalar_lea.hbm %s240_s0, 256 }
   0x2   :  { %s15_s13 = sshll.u32 %s174_s12, 4  ;;  %p127_p0 = scmp.ne.s32.totalorder %s240_s0, %s126_s16  ;;  %s16_s13 = int_to_ptr.vmem [resolvable:$true] %s15_s13 }
   0x3   :  { %p130_p1 = scmp.lt.u32.totalorder %s126_s16, %s240_s0 }
   0x5   :  { %p132_p2 = pnand %p130_p1, %p127_p0 }
   0x7   :  { %135 = shalt.err (!%p132_p2)
}
   0x8   :  { %s136_s21 = scalar_lea.vmem %s16_s13, 256  ;;  %p141_p4 = scmp.lt.s32.totalorder %s16_s13, %s16_s13 }
   0x9   :  { %p137_p3 = scmp.ne.s32.totalorder %s16_s13, %s136_s21  ;;  %p142_p5 = scmp.lt.s32.totalorder %s136_s21, %s136_s21 }
   0xb   :  { %p143_p6 = por %p142_p5, %p141_p4 }
   0xd   :  { %p144_p7 = pnand %p143_p6, %p137_p3 }
   0xf   :  { %147 = shalt.err (!%p144_p7)
}
  0x10   :  { %s175_s22 = smov 128   ;;  %s176_s23 = smov 8  }
  0x11   :  { %21 = dma.hbm_to_vmem [thread:$0]  %s240_s0, 256, %s16_s13, [#allocation3], %s175_s22, %s175_s22, %s176_s23  }
  0x12   :  { %170 = dma.done.wait [#allocation3], 256  }
  0x13   :  { %171 = vsyncadd [#allocation3], 4294967040  ;;  %vm31_vm0 = vcmask 261120   ;;  %v29_v0 = vld [vmem:[#allocation2] sm:$0xff]  ;;  %v30_v1 = vld [vmem:[#allocation2 + $0x8] sm:$0xff]  ;;  %s177_s29 = smov [#allocation5]  }
  0x14   :  { %v32_v2 = vsel %vm31_vm0, %v29_v0, 0.0  ;;  %v35_v3 = vsel %vm31_vm0, %v30_v1, 0.0  ;;  %v112_v31 = vld [vmem:[%s241_s1] ss:$0 sm:$0xff]  ;;  %s100_s30 = sshll.u32 %s177_s29, 4  ;;  %s101_s30 = int_to_ptr.vmem [resolvable:$true] %s100_s30 }
  0x15   :  { %33 = vadd.xlane.f32.xlu0 %v32_v2  ;;  %v113_v33 = vld [vmem:[%s242_s2] ss:$0 sm:$0xff]  ;;  %s148_s4 = scalar_lea.vmem %s101_s30, 256  ;;  %p153_p9 = scmp.lt.s32.totalorder %s101_s30, %s101_s30 }
  0x16   :  { %p149_p8 = scmp.ne.s32.totalorder %s101_s30, %s148_s4  ;;  %p154_p10 = scmp.lt.s32.totalorder %s148_s4, %s148_s4 }
  0x18   :  { %p155_p11 = por %p154_p10, %p153_p9 }
  0x19   :  { %36 = vadd.xlane.f32.xlu0 %v35_v3 }
  0x1a   :  { %p156_p12 = pnand %p155_p11, %p149_p8 }
  0xa2   :  { %v34_v4 = vpop.xlane.xlu0 %33 }
  0xa3   :  { %v39_v5 = vmul.f32 0.03125, %v34_v4 }
  0xa5   :  { %v41_v6 = vsub.f32 %v29_v0, %v39_v5 }
  0xa6   :  { %v37_v7 = vpop.xlane.xlu0 %36 }
  0xa7   :  { %v40_v8 = vmul.f32 0.03125, %v37_v7  ;;  %v43_v9 = vmul.f32 %v41_v6, %v41_v6 }
  0xa9   :  { %v42_v10 = vsub.f32 %v30_v1, %v40_v8  ;;  %v45_v11 = vsel %vm31_vm0, %v43_v9, 0.0 }
  0xaa   :  { %46 = vadd.xlane.f32.xlu1 %v45_v11 }
  0xab   :  { %v44_v12 = vmul.f32 %v42_v10, %v42_v10 }
  0xad   :  { %v48_v13 = vsel %vm31_vm0, %v44_v12, 0.0 }
  0xae   :  { %49 = vadd.xlane.f32.xlu1 %v48_v13 }
 0x137   :  { %v47_v14 = vpop.xlane.xlu1 %46 }
 0x138   :  { %v51_v15 = vmul.f32 0.032258064, %v47_v14 }
 0x13a   :  { %118 = vrsqrt.f32 %v51_v15  ;;  %vm55_vm1 = vcmp.eq.f32.partialorder %v51_v15, inf  ;;  %v58_v20 = vand.u32 2147483648, %v51_v15  ;;  %vm57_vm2 = vcmp.eq.f32.partialorder %v51_v15, 0.0 }
 0x13b   :  { %v50_v16 = vpop.xlane.xlu1 %49 }
 0x13c   :  { %v52_v17 = vmul.f32 0.032258064, %v50_v16 }
 0x13e   :  { %120 = vrsqrt.f32 %v52_v17  ;;  %vm62_vm3 = vcmp.eq.f32.partialorder %v52_v17, inf  ;;  %v65_v26 = vand.u32 2147483648, %v52_v17  ;;  %vm64_vm4 = vcmp.eq.f32.partialorder %v52_v17, 0.0 }
 0x144   :  { %v119_v18 = vpop.eup %118 }
 0x145   :  { %v54_v19 = vmul.f32 %v119_v18, %v51_v15 }
 0x147   :  { %v56_v21 = vsel %vm55_vm1, %v51_v15, %v54_v19 }
 0x148   :  { %v121_v22 = vpop.eup %120  ;;  %v59_v23 = vsel %vm57_vm2, %v58_v20, %v56_v21 }
 0x149   :  { %v67_v24 = vadd.f32 1e-06, %v59_v23  ;;  %v61_v25 = vmul.f32 %v121_v22, %v52_v17 }
 0x14b   :  { %122 = vrcp.f32 %v67_v24  ;;  %v63_v27 = vsel %vm62_vm3, %v52_v17, %v61_v25 }
 0x14c   :  { %v66_v28 = vsel %vm64_vm4, %v65_v26, %v63_v27 }
 0x14d   :  { %v68_v29 = vadd.f32 1e-06, %v66_v28 }
 0x14f   :  { %124 = vrcp.f32 %v68_v29 }
 0x155   :  { %v123_v30 = vpop.eup %122 }
 0x156   :  { %v74_v32 = vmul.f32 %v123_v30, %v41_v6 }
 0x158   :  { %v82_v34 = vmul.f32 %v112_v31, %v74_v32 }
 0x159   :  { %v125_v35 = vpop.eup %124 }
 0x15a   :  { %v75_v36 = vmul.f32 %v125_v35, %v42_v10  ;;  %v91_v37 = vadd.f32 %v113_v33, %v82_v34 }
 0x15c   :  { %v83_v38 = vmul.f32 %v112_v31, %v75_v36  ;;  %93 = vst.msk [vmem:[#allocation5] sm:$0xff] %vm31_vm0, %v91_v37 }
 0x15e   :  { %v92_v39 = vadd.f32 %v113_v33, %v83_v38 }
 0x160   :  { %94 = vst.msk [vmem:[#allocation5 + $0x8] sm:$0xff] %vm31_vm0, %v92_v39 }
 0x161   :  { %159 = shalt.err (!%p156_p12)
}
 0x162   :  { %s160_s5 = scalar_lea.hbm %s243_s3, 256 }
 0x163   :  { %p161_p13 = scmp.ne.s32.totalorder %s243_s3, %s160_s5  ;;  %p164_p0 = scmp.lt.u32.totalorder %s160_s5, %s243_s3 }
 0x165   :  { %p166_p1 = pnand %p164_p0, %p161_p13 }
 0x167   :  { %169 = shalt.err (!%p166_p1)
}
 0x168   :  { %106 = dma.vmem_to_hbm [thread:$0]  %s101_s30, 256, %s243_s3, [#allocation4], %s175_s22, %s175_s22, %s176_s23  }
 0x169   :  { %172 = dma.done.wait [#allocation4], 256  }
 0x16a   :  { %173 = vsyncadd [#allocation4], 4294967040 }
 0x16b   :  { %110 = vsyncpa [#allocation3], 1 }
 0x16c   :  { %111 = vsyncpa [#allocation4], 1 }

</bundles_post_ra>
